<compile_context>
chip_gen: v5e
topology: v5e:2x2
jax: 0.10.0
libtpu: 0.0.40
codegen_flags: <defaults>
</compile_context>

<pallas_src>
import jax
import jax.numpy as jnp
from jax.experimental import pallas as pl
from jax.experimental.pallas import tpu as pltpu

_LANE = 128
_TARGET_BLOCK_BYTES = 2 << 20   # ~2 MiB per block; double-buffered in+out = 8 MiB
_MAX_ROW_BYTES = 8 << 20        # guard: don't keep a huge trailing dim as the lane dim


def _sublane_pack(dtype) -> int:
    """Native sublane packing for a dtype: 8 (4B), 16 (2B), 32 (1B)."""
    return max(8, 32 // jnp.dtype(dtype).itemsize)


def squared_relu_kernel(x_ref, o_ref):
    """Elementwise relu(x)^2 on one lane-dense (row_tile, lane) block."""
    x = x_ref[...]
    y = jnp.maximum(x, jnp.zeros((), dtype=x.dtype))
    o_ref[...] = (y * y).astype(o_ref.dtype)


def _run_2d(x2d):
    """Run the elementwise kernel over a lane-dense 2-D slab (rows, lane)."""
    rows, lane = x2d.shape
    dtype = x2d.dtype
    itemsize = jnp.dtype(dtype).itemsize
    pack = _sublane_pack(dtype)

    bytes_per_row = lane * itemsize
    # Rows per block targeting ~2 MiB, rounded down to the dtype's sublane pack.
    tile_rows = max(pack, (_TARGET_BLOCK_BYTES // bytes_per_row) // pack * pack)

    if rows <= tile_rows:
        # Single block covering the full (possibly ragged) rows dim — allowed
        # because the block dim equals the full array dim.
        row_tile = rows
        grid = (1,)
    else:
        row_tile = tile_rows
        grid = (pl.cdiv(rows, row_tile),)   # ragged last block: OOB writes dropped

    n = rows * lane
    return pl.pallas_call(
        squared_relu_kernel,
        out_shape=jax.ShapeDtypeStruct((rows, lane), dtype),
        grid_spec=pltpu.PrefetchScalarGridSpec(
            num_scalar_prefetch=0,
            grid=grid,
            in_specs=[pl.BlockSpec((row_tile, lane), lambda i: (i, 0))],
            out_specs=pl.BlockSpec((row_tile, lane), lambda i: (i, 0)),
        ),
        compiler_params=pltpu.CompilerParams(
            dimension_semantics=("parallel",)),
        cost_estimate=pl.CostEstimate(
            flops=2 * n, transcendentals=0, bytes_accessed=2 * n * itemsize),
    )(x2d)


def squared_relu(x):
    """SquaredReLU forward for an arbitrary-shaped array (matches torch module)."""
    orig_shape = x.shape
    n = x.size
    if n == 0:
        return x

    itemsize = jnp.dtype(x.dtype).itemsize
    pack = _sublane_pack(x.dtype)
    last = orig_shape[-1] if x.ndim >= 1 else 1

    if (x.ndim >= 2 and last % _LANE == 0
            and last * itemsize * pack <= _MAX_ROW_BYTES):
        # Zero-cost collapsed view keeping the already lane-dense trailing dim.
        x2d = x.reshape(n // last, last)
        return _run_2d(x2d).reshape(orig_shape)

    if n % _LANE == 0:
        # Flat lane-dense slab: still no pad / slice round trip.
        x2d = x.reshape(n // _LANE, _LANE)
        return _run_2d(x2d).reshape(orig_shape)

    # Rare ragged tail: pad the flat input up to a multiple of the lane width.
    rows = pl.cdiv(n, _LANE)
    total = rows * _LANE
    x_flat = jnp.pad(jnp.ravel(x), (0, total - n))
    out2d = _run_2d(x_flat.reshape(rows, _LANE))
    return out2d.reshape(-1)[:n].reshape(orig_shape)


def squared_relu_ref(x):
    """Pure-JAX reference mirroring the PyTorch forward exactly."""
    y = jnp.maximum(x, jnp.zeros((), dtype=x.dtype))
    return y * y


if __name__ == "__main__":
    key = jax.random.PRNGKey(0)
    k0, k1, k2 = jax.random.split(key, 3)

    # Primary shape consistent with the module: batch=2, channels=4, spatial=16x16.
    x = jax.random.normal(k0, (2, 4, 16, 16), dtype=jnp.float32)
    out = jax.block_until_ready(squared_relu(x))
    ref = squared_relu_ref(x)
    assert out.shape == x.shape and out.dtype == x.dtype
    assert jnp.allclose(out, ref, rtol=1e-6, atol=1e-6), "f32 mismatch vs reference"

    # Lane-dense trailing dim (collapsed-view fast path) + bf16 sublane packing.
    xb = jax.random.normal(k1, (2, 8, 256), dtype=jnp.float32).astype(jnp.bfloat16)
    outb = jax.block_until_ready(squared_relu(xb))
    assert outb.shape == xb.shape and outb.dtype == xb.dtype
    assert jnp.allclose(outb.astype(jnp.float32),
                        squared_relu_ref(xb).astype(jnp.float32),
                        rtol=1e-2, atol=1e-2), "bf16 mismatch vs reference"

    # Ragged size (pad path).
    xo = jax.random.normal(k2, (1000,), dtype=jnp.float32)
    outo = jax.block_until_ready(squared_relu(xo))
    assert outo.shape == xo.shape
    assert jnp.allclose(outo, squared_relu_ref(xo), rtol=1e-6, atol=1e-6), \
        "ragged mismatch vs reference"

    print("KERNEL_OK")
</pallas_src>

<mosaic_0001>
module attributes {stable_mosaic.version = 11 : i64} {
  func.func @squared_relu_kernel(%arg0: i32, %arg1: memref<16x128xf32, #tpu.memory_space<vmem>>, %arg2: memref<16x128xf32, #tpu.memory_space<vmem>>) attributes {dimension_semantics = [#tpu.dimension_semantics<parallel>], iteration_bounds = array<i64: 1>, scalar_prefetch = 0 : i64, scratch_operands = 0 : i64, tpu.core_type = #tpu.core_type<tc>, window_params = [{transform_indices = @transform_0, window_bounds = array<i64: 16, 128>}, {transform_indices = @transform_1, window_bounds = array<i64: 16, 128>}]} {
    %c0 = arith.constant 0 : index
    %c0_0 = arith.constant 0 : index
    %0 = vector.load %arg1[%c0, %c0_0] : memref<16x128xf32, #tpu.memory_space<vmem>>, vector<16x128xf32>
    %cst = arith.constant 0.000000e+00 : f32
    %1 = vector.broadcast %cst : f32 to vector<16x128xf32>
    %2 = arith.maximumf %0, %1 : vector<16x128xf32>
    %3 = arith.mulf %2, %2 : vector<16x128xf32>
    %c0_1 = arith.constant 0 : index
    %c0_2 = arith.constant 0 : index
    %4 = vector.load %arg2[%c0_1, %c0_2] : memref<16x128xf32, #tpu.memory_space<vmem>>, vector<16x128xf32>
    tpu.vector_store %arg2[%c0_1, %c0_2], %3 {strides = array<i32>} : memref<16x128xf32, #tpu.memory_space<vmem>>, vector<16x128xf32>,
    return
  }
  func.func @transform_0(%arg0: i32) -> (i32, i32) {
    %c0_i32 = arith.constant 0 : i32
    %c0_i32_0 = arith.constant 0 : i32
    return %arg0, %c0_i32 : i32, i32
  }
  func.func @transform_1(%arg0: i32) -> (i32, i32) {
    %c0_i32 = arith.constant 0 : i32
    %c0_i32_0 = arith.constant 0 : i32
    return %arg0, %c0_i32 : i32, i32
  }
}

</mosaic_0001>

<bundles_post_ra>
// kernel: tpu_custom_call.1
= control target key start
LH: loop header
LB: loop body
LE: loop exit
PB: predicated region body
PF: predicated region fallthrough
CT: control target
= control target key end

     0   :  { %6 = vsyncpa [#allocation3], 0  ;;  %s128_s0 = inlined_call_operand.hbm [shape: f32[16,128], index: 0, kind: input, shape index: {}]   ;;  %s129_s1 = inlined_call_operand.hbm [shape: f32[16,128], index: 1, kind: output, shape index: {}]  }
   0x1   :  { %7 = vsyncpa [#allocation4], 0  ;;  %s12_s8 = sshll.u32 %s128_s0, 4  ;;  %s108_s9 = smov [#allocation2]   ;;  %s13_s8 = int_to_ptr.hbm [resolvable:$true] %s12_s8 }
   0x2   :  { %s14_s10 = sshll.u32 %s108_s9, 4  ;;  %s109_s11 = smov 128   ;;  %s15_s10 = int_to_ptr.vmem [resolvable:$true] %s14_s10 }
   0x3   :  { %s110_s12 = smov 8  }
   0x4   :  { %20 = dma.hbm_to_vmem [thread:$0]  %s13_s8, 256, %s15_s10, [#allocation3], %s109_s11, %s109_s11, %s110_s12  }
   0x5   :  { %104 = dma.done.wait [#allocation3], 256  }
   0x6   :  { %105 = vsyncadd [#allocation3], 4294967040  ;;  %v25_v0 = vld [vmem:[#allocation2] sm:$0xff]  ;;  %v26_v1 = vld [vmem:[#allocation2 + $0x8] sm:$0xff]  ;;  %s111_s13 = smov [#allocation5]   ;;  %s39_s17 = sshll.u32 %s129_s1, 4  ;;  %s40_s17 = int_to_ptr.hbm [resolvable:$true] %s39_s17 }
   0x7   :  { %v27_v2 = vmax.f32 %v25_v0, 0.0  ;;  %v28_v3 = vmax.f32 %v26_v1, 0.0  ;;  %s37_s14 = sshll.u32 %s111_s13, 4  ;;  %s38_s14 = int_to_ptr.vmem [resolvable:$true] %s37_s14 }
   0x9   :  { %v29_v4 = vmul.f32 %v27_v2, %v27_v2  ;;  %v30_v5 = vmul.f32 %v28_v3, %v28_v3 }
   0xb   :  { %31 = vst [vmem:[#allocation5] sm:$0xff] %v29_v4 }
   0xc   :  { %32 = vst [vmem:[#allocation5 + $0x8] sm:$0xff] %v30_v5 }
   0xd   :  { %45 = dma.vmem_to_hbm [thread:$0]  %s38_s14, 256, %s40_s17, [#allocation4], %s109_s11, %s109_s11, %s110_s12  }
   0xe   :  { %106 = dma.done.wait [#allocation4], 256  }
   0xf   :  { %107 = vsyncadd [#allocation4], 4294967040 }
  0x10   :  { %50 = vsyncpa [#allocation3], 1 }
  0x11   :  { %51 = vsyncpa [#allocation4], 1 }

</bundles_post_ra>
